<compile_context>
chip_gen: v5e
topology: v5e:2x2
jax: 0.10.0
libtpu: 0.0.40
codegen_flags: <defaults>
</compile_context>

<pallas_src>
import functools

import jax
import jax.numpy as jnp
from jax import lax
from jax.experimental import pallas as pl
from jax.experimental.pallas import tpu as pltpu


def _round_up(a, b):
    return -(-a // b) * b


def _vmem_capacity_bytes():
    """Physical VMEM of the local TPU generation; worst-case (v7x) fallback."""
    try:
        cap = getattr(pltpu.get_tpu_info(), "vmem_capacity_bytes", None)
        if cap:
            return int(cap)
    except Exception:
        pass
    return 64 << 20


def _estimate_vmem(c, t, halo, itemsize, mm_itemsize):
    """Rough per-step VMEM footprint of the fused kernel (bytes)."""
    io = 2 * itemsize * c * (2 * t + halo)          # tile + halo + out, double-buffered
    masks = 2 * 2 * t * 4 * 2                        # two (1, T) masks, double-buffered
    params = 2 * (2 * c * c * mm_itemsize + 16 * c * 4)
    scratch = 4 * c * (t + halo)                     # staged f32 tile + halo
    temps = 8 * 4 * c * t                            # live f32 temporaries
    return io + masks + params + scratch + temps


def _pick_spatial_tile(hw, halo, c, itemsize, mm_itemsize, budget, batch):
    """Lane tile: a multiple of `halo` (itself a multiple of 128), as large as
    the VMEM budget / image allow; for batch==1 keep >= 2 tiles so v7x can
    shard the grid across both TensorCores."""
    t_img = _round_up(hw, halo)
    t_cap = min(t_img, max(halo, (8192 // halo) * halo))
    k = 1
    while ((k + 1) * halo <= t_cap and
           _estimate_vmem(c, (k + 1) * halo, halo, itemsize, mm_itemsize)
           <= budget):
        k += 1
    t = k * halo
    if batch == 1 and t_img > halo:
        t = min(t, max(halo, _round_up(-(-hw // 2), halo)))
    return t


# ---------------------------------------------------------------------------
# Fused kernel: depthwise 3x3 + pointwise 1x1 + ReLU + LN + 1x1 + ReLU + LN.
# ---------------------------------------------------------------------------
def _lfb_kernel(x0_ref, xh_ref, m0_ref, m2_ref, kt_ref, bdw_ref,
                w1_ref, b1_ref, g_ref, bb_ref, w2_ref, b2_ref,
                o_ref, xw_ref, *, w, t_hw, eps, inv_c, mm_dtype):
    # x0_ref : (1, C, T)    current flattened-spatial tile (shifted by W+1 pad)
    # xh_ref : (1, C, halo) first `halo` lanes of the NEXT tile (3x3 halo)
    # m0/m2  : (1, T) f32   border masks for the west / east taps
    # kt_ref : (C, 9) f32   per-channel 3x3 taps (kh-major, kw-minor)
    # bdw    : (C, 1) f32   depthwise bias
    # w1/w2  : (C, C)       pointwise / conv1x1 weights; b1/b2: (C, 1) biases
    # g/bb   : (C, 1) f32   shared LayerNormChannelsFirst affine params
    # o_ref  : (1, C, T)    output tile
    # xw_ref : (C, T+halo)  f32 VMEM scratch for the staged tile + halo
    f32 = jnp.float32

    # Stage the tile and its halo once (aligned stores, single cast).
    xw_ref[:, :t_hw] = x0_ref[0].astype(f32)
    xw_ref[:, t_hw:] = xh_ref[0].astype(f32)

    kt = kt_ref[...]

    def tap(kh, kw):
        s = kh * w + kw                                # constant lane offset
        return xw_ref[:, s:s + t_hw] * kt[:, 3 * kh + kw:3 * kh + kw + 1]

    # Depthwise 3x3: group taps by kw so each border mask is applied once.
    west = tap(0, 0) + tap(1, 0) + tap(2, 0)           # invalid at column 0
    mid = tap(0, 1) + tap(1, 1) + tap(2, 1)
    east = tap(0, 2) + tap(1, 2) + tap(2, 2)           # invalid at column W-1
    y = west * m0_ref[...] + mid + east * m2_ref[...] + bdw_ref[...]

    g = g_ref[...]
    bb = bb_ref[...]

    def ln_channels_first(z):
        # LayerNorm over the channel (sublane) axis, per pixel (lane).
        mean = jnp.sum(z, axis=0, keepdims=True) * inv_c
        zc = z - mean
        var = jnp.sum(zc * zc, axis=0, keepdims=True) * inv_c
        return g * (zc * lax.rsqrt(var + eps)) + bb

    z = jnp.dot(w1_ref[...], y.astype(mm_dtype),
                preferred_element_type=f32) + b1_ref[...]      # pointwise 1x1
    z = jnp.maximum(z, 0.0)                                    # ReLU
    z = ln_channels_first(z)                                   # norm1
    z = jnp.dot(w2_ref[...], z.astype(mm_dtype),
                preferred_element_type=f32) + b2_ref[...]      # conv1x1
    z = jnp.maximum(z, 0.0)                                    # ReLU
    z = ln_channels_first(z)                                   # norm1 (shared)
    o_ref[0] = z.astype(o_ref.dtype)


# ---------------------------------------------------------------------------
# Wrapper: full LocalFeatureBlock forward.
# ---------------------------------------------------------------------------
def local_feature_block(x, dw_w, dw_b, pw_w, pw_b, ln_w, ln_b, c11_w, c11_b,
                        eps=1e-6):
    """x: (B, C, H, W); dw_w: (C,1,3,3); pw_w/c11_w: (C,C,1,1); vectors: (C,)."""
    B, C, H, W = x.shape
    assert dw_w.shape == (C, 1, 3, 3)
    assert pw_w.shape == (C, C, 1, 1) and c11_w.shape == (C, C, 1, 1)
    f32 = jnp.float32
    itemsize = jnp.dtype(x.dtype).itemsize
    HW = H * W

    mm_dtype = jnp.bfloat16 if C >= 256 else f32       # bf16 MXU inputs for big C
    mm_itemsize = jnp.dtype(mm_dtype).itemsize

    # ---- generation-aware tile / VMEM sizing --------------------------------
    halo = _round_up(2 * W + 2, 128)     # next-tile lanes a 3x3 stencil can need
    cap = _vmem_capacity_bytes()
    budget = max(4 << 20, min(cap // 3, 48 << 20))
    t_hw = _pick_spatial_tile(HW, halo, C, itemsize, mm_itemsize, budget, B)
    n_t = -(-HW // t_hw)
    hw_pad = n_t * t_hw
    L_in = hw_pad + t_hw                 # multiple of both t_hw and halo

    est = _estimate_vmem(C, t_hw, halo, itemsize, mm_itemsize)
    vmem_limit = int(min(cap - (8 << 20), max(32 << 20, 2 * est)))

    # ---- input staging (the only remaining off-kernel pass) -----------------
    # Flatten spatial row-major and shift right by W+1 zeros so every 3x3 tap
    # becomes a non-negative constant lane offset s = kh*W + kw; tail zeros
    # align the buffer to whole tiles plus one halo-reachable tile.
    xin = jnp.pad(x.reshape(B, C, HW),
                  ((0, 0), (0, 0), (W + 1, L_in - HW - (W + 1))))
    # TODO(synk): the halo/alignment padding could also be folded into the
    # kernel with masked loads to drop this last jnp.pad pass over x.

    # Border masks: west taps (kw=0) wrap to the previous row at image column
    # 0; east taps (kw=2) wrap to the next row at column W-1.  Zero them.
    col = jnp.arange(hw_pad, dtype=jnp.int32) % W
    m0 = (col != 0).astype(f32).reshape(1, hw_pad)
    m2 = (col != (W - 1)).astype(f32).reshape(1, hw_pad)

    # ---- parameters ----------------------------------------------------------
    kt = dw_w.reshape(C, 9).astype(f32)
    bdw = dw_b.reshape(C, 1).astype(f32)
    w1 = pw_w.reshape(C, C).astype(mm_dtype)
    b1 = pw_b.reshape(C, 1).astype(f32)
    g = ln_w.reshape(C, 1).astype(f32)
    bb = ln_b.reshape(C, 1).astype(f32)
    w2 = c11_w.reshape(C, C).astype(mm_dtype)
    b2 = c11_b.reshape(C, 1).astype(f32)

    hb = t_hw // halo                    # halo blocks per spatial tile
    const = lambda b, t: (0, 0)          # grid-invariant parameter blocks

    out = pl.pallas_call(
        functools.partial(_lfb_kernel, w=W, t_hw=t_hw, eps=float(eps),
                          inv_c=1.0 / C, mm_dtype=mm_dtype),
        out_shape=jax.ShapeDtypeStruct((B, C, hw_pad), x.dtype),
        grid_spec=pltpu.PrefetchScalarGridSpec(
            num_scalar_prefetch=0,
            grid=(B, n_t),
            in_specs=[
                pl.BlockSpec((1, C, t_hw), lambda b, t: (b, 0, t)),            # tile
                pl.BlockSpec((1, C, halo), lambda b, t: (b, 0, (t + 1) * hb)),  # halo
                pl.BlockSpec((1, t_hw), lambda b, t: (0, t)),                  # west mask
                pl.BlockSpec((1, t_hw), lambda b, t: (0, t)),                  # east mask
                pl.BlockSpec((C, 9), const),
                pl.BlockSpec((C, 1), const),
                pl.BlockSpec((C, C), const),
                pl.BlockSpec((C, 1), const),
                pl.BlockSpec((C, 1), const),
                pl.BlockSpec((C, 1), const),
                pl.BlockSpec((C, C), const),
                pl.BlockSpec((C, 1), const),
            ],
            out_specs=pl.BlockSpec((1, C, t_hw), lambda b, t: (b, 0, t)),
            scratch_shapes=[pltpu.VMEM((C, t_hw + halo), f32)],
        ),
        compiler_params=pltpu.CompilerParams(
            dimension_semantics=("parallel", "parallel"),
            vmem_limit_bytes=vmem_limit,
        ),
    )(xin, xin, m0, m2, kt, bdw, w1, b1, g, bb, w2, b2)

    # Drop the padded tail (free when HW is already a tile multiple).
    return out[:, :, :HW].reshape(B, C, H, W)


# ---------------------------------------------------------------------------
# Pure-JAX reference mirroring the PyTorch forward.
# ---------------------------------------------------------------------------
def _layernorm_cf_ref(x, w, b, eps):
    mean = jnp.mean(x, axis=1, keepdims=True)
    var = jnp.mean((x - mean) ** 2, axis=1, keepdims=True)
    xn = (x - mean) / jnp.sqrt(var + eps)
    return w[None, :, None, None] * xn + b[None, :, None, None]


def _reference(x, dw_w, dw_b, pw_w, pw_b, ln_w, ln_b, c11_w, c11_b, eps=1e-6):
    C = x.shape[1]
    dn = ("NCHW", "OIHW", "NCHW")
    y = lax.conv_general_dilated(x, dw_w, (1, 1), ((1, 1), (1, 1)),
                                 dimension_numbers=dn, feature_group_count=C)
    y = y + dw_b[None, :, None, None]
    y = lax.conv_general_dilated(y, pw_w, (1, 1), "VALID", dimension_numbers=dn)
    y = y + pw_b[None, :, None, None]
    y = jnp.maximum(y, 0.0)
    y = _layernorm_cf_ref(y, ln_w, ln_b, eps)
    y = lax.conv_general_dilated(y, c11_w, (1, 1), "VALID", dimension_numbers=dn)
    y = y + c11_b[None, :, None, None]
    y = jnp.maximum(y, 0.0)
    y = _layernorm_cf_ref(y, ln_w, ln_b, eps)
    return y


if __name__ == "__main__":
    lfb = jax.jit(local_feature_block)

    def run_case(case_idx, B, C, H, W):
        keys = jax.random.split(
            jax.random.fold_in(jax.random.PRNGKey(0), case_idx), 9)
        x = jax.random.normal(keys[0], (B, C, H, W), jnp.float32)
        dw_w = 0.2 * jax.random.normal(keys[1], (C, 1, 3, 3), jnp.float32)
        dw_b = 0.1 * jax.random.normal(keys[2], (C,), jnp.float32)
        pw_w = 0.5 * jax.random.normal(keys[3], (C, C, 1, 1), jnp.float32)
        pw_b = 0.1 * jax.random.normal(keys[4], (C,), jnp.float32)
        ln_w = 1.0 + 0.1 * jax.random.normal(keys[5], (C,), jnp.float32)
        ln_b = 0.1 * jax.random.normal(keys[6], (C,), jnp.float32)
        c11_w = 0.5 * jax.random.normal(keys[7], (C, C, 1, 1), jnp.float32)
        c11_b = 0.1 * jax.random.normal(keys[8], (C,), jnp.float32)

        out = jax.block_until_ready(
            lfb(x, dw_w, dw_b, pw_w, pw_b, ln_w, ln_b, c11_w, c11_b))
        ref = _reference(x, dw_w, dw_b, pw_w, pw_b, ln_w, ln_b, c11_w, c11_b)

        assert out.shape == (B, C, H, W)
        assert bool(jnp.all(jnp.isfinite(out)))
        err = float(jnp.max(jnp.abs(out - ref)))
        # f32 in-kernel compute; tolerance covers MXU / rsqrt rounding vs the
        # XLA conv reference.
        assert err < 5e-3, f"case {case_idx}: max abs err {err}"

    run_case(0, B=2, C=4, H=16, W=16)   # shapes implied by the module spec
    run_case(1, B=1, C=8, H=7, W=7)     # HW < one tile (tail-padding path)
    run_case(2, B=1, C=16, H=9, W=20)   # multiple tiles, halo crossing mid-row
    print("KERNEL_OK")
</pallas_src>

<mosaic_0001>
module attributes {stable_mosaic.version = 11 : i64} {
  func.func @_lfb_kernel(%arg0: i32, %arg1: i32, %arg2: memref<1x4x256xf32, #tpu.memory_space<vmem>>, %arg3: memref<1x4x128xf32, #tpu.memory_space<vmem>>, %arg4: memref<1x256xf32, #tpu.memory_space<vmem>>, %arg5: memref<1x256xf32, #tpu.memory_space<vmem>>, %arg6: memref<4x9xf32, #tpu.memory_space<vmem>>, %arg7: memref<4x1xf32, #tpu.memory_space<vmem>>, %arg8: memref<4x4xf32, #tpu.memory_space<vmem>>, %arg9: memref<4x1xf32, #tpu.memory_space<vmem>>, %arg10: memref<4x1xf32, #tpu.memory_space<vmem>>, %arg11: memref<4x1xf32, #tpu.memory_space<vmem>>, %arg12: memref<4x4xf32, #tpu.memory_space<vmem>>, %arg13: memref<4x1xf32, #tpu.memory_space<vmem>>, %arg14: memref<1x4x256xf32, #tpu.memory_space<vmem>>, %arg15: memref<4x384xf32, #tpu.memory_space<vmem>>) attributes {dimension_semantics = [#tpu.dimension_semantics<parallel>, #tpu.dimension_semantics<parallel>], iteration_bounds = array<i64: 2, 1>, scalar_prefetch = 0 : i64, scratch_operands = 1 : i64, tpu.core_type = #tpu.core_type<tc>, window_params = [{transform_indices = @transform_0, window_bounds = array<i64: 1, 4, 256>}, {transform_indices = @transform_1, window_bounds = array<i64: 1, 4, 128>}, {transform_indices = @transform_2, window_bounds = array<i64: 1, 256>}, {transform_indices = @transform_3, window_bounds = array<i64: 1, 256>}, {pipeline_mode = #tpu.pipeline_mode<synchronous>, transform_indices = @transform_4, window_bounds = array<i64: 4, 9>}, {pipeline_mode = #tpu.pipeline_mode<synchronous>, transform_indices = @transform_5, window_bounds = array<i64: 4, 1>}, {pipeline_mode = #tpu.pipeline_mode<synchronous>, transform_indices = @transform_6, window_bounds = array<i64: 4, 4>}, {pipeline_mode = #tpu.pipeline_mode<synchronous>, transform_indices = @transform_7, window_bounds = array<i64: 4, 1>}, {pipeline_mode = #tpu.pipeline_mode<synchronous>, transform_indices = @transform_8, window_bounds = array<i64: 4, 1>}, {pipeline_mode = #tpu.pipeline_mode<synchronous>, transform_indices = @transform_9, window_bounds = array<i64: 4, 1>}, {pipeline_mode = #tpu.pipeline_mode<synchronous>, transform_indices = @transform_10, window_bounds = array<i64: 4, 4>}, {pipeline_mode = #tpu.pipeline_mode<synchronous>, transform_indices = @transform_11, window_bounds = array<i64: 4, 1>}, {transform_indices = @transform_12, window_bounds = array<i64: 1, 4, 256>}]} {
    %c0 = arith.constant 0 : index
    %c0_0 = arith.constant 0 : index
    %c0_1 = arith.constant 0 : index
    %0 = vector.load %arg2[%c0, %c0_0, %c0_1] : memref<1x4x256xf32, #tpu.memory_space<vmem>>, vector<1x4x256xf32>
    %1 = vector.shape_cast %0 : vector<1x4x256xf32> to vector<4x256xf32>
    %c0_2 = arith.constant 0 : index
    %c0_3 = arith.constant 0 : index
    %2 = vector.load %arg15[%c0_2, %c0_3] : memref<4x384xf32, #tpu.memory_space<vmem>>, vector<4x256xf32>
    tpu.vector_store %arg15[%c0_2, %c0_3], %1 {strides = array<i32>} : memref<4x384xf32, #tpu.memory_space<vmem>>, vector<4x256xf32>,
    %c0_4 = arith.constant 0 : index
    %c0_5 = arith.constant 0 : index
    %c0_6 = arith.constant 0 : index
    %3 = vector.load %arg3[%c0_4, %c0_5, %c0_6] : memref<1x4x128xf32, #tpu.memory_space<vmem>>, vector<1x4x128xf32>
    %4 = vector.shape_cast %3 : vector<1x4x128xf32> to vector<4x128xf32>
    %c0_7 = arith.constant 0 : index
    %c256 = arith.constant 256 : index
    %5 = vector.load %arg15[%c0_7, %c256] : memref<4x384xf32, #tpu.memory_space<vmem>>, vector<4x128xf32>
    tpu.vector_store %arg15[%c0_7, %c256], %4 {strides = array<i32>} : memref<4x384xf32, #tpu.memory_space<vmem>>, vector<4x128xf32>,
    %c0_8 = arith.constant 0 : index
    %c0_9 = arith.constant 0 : index
    %6 = vector.load %arg6[%c0_8, %c0_9] : memref<4x9xf32, #tpu.memory_space<vmem>>, vector<4x9xf32>
    %c0_10 = arith.constant 0 : index
    %c0_11 = arith.constant 0 : index
    %7 = vector.load %arg15[%c0_10, %c0_11] : memref<4x384xf32, #tpu.memory_space<vmem>>, vector<4x256xf32>
    %8 = vector.extract_strided_slice %6 {offsets = [0, 0], sizes = [4, 1], strides = [1, 1]} : vector<4x9xf32> to vector<4x1xf32>
    %9 = vector.broadcast %8 : vector<4x1xf32> to vector<4x256xf32>
    %10 = arith.mulf %7, %9 : vector<4x256xf32>
    %c0_12 = arith.constant 0 : index
    %c16 = arith.constant 16 : index
    %11 = vector.load %arg15[%c0_12, %c16] : memref<4x384xf32, #tpu.memory_space<vmem>>, vector<4x256xf32>
    %12 = vector.extract_strided_slice %6 {offsets = [0, 3], sizes = [4, 1], strides = [1, 1]} : vector<4x9xf32> to vector<4x1xf32>
    %13 = vector.broadcast %12 : vector<4x1xf32> to vector<4x256xf32>
    %14 = arith.mulf %11, %13 : vector<4x256xf32>
    %15 = arith.addf %10, %14 : vector<4x256xf32>
    %c0_13 = arith.constant 0 : index
    %c32 = arith.constant 32 : index
    %16 = vector.load %arg15[%c0_13, %c32] : memref<4x384xf32, #tpu.memory_space<vmem>>, vector<4x256xf32>
    %17 = vector.extract_strided_slice %6 {offsets = [0, 6], sizes = [4, 1], strides = [1, 1]} : vector<4x9xf32> to vector<4x1xf32>
    %18 = vector.broadcast %17 : vector<4x1xf32> to vector<4x256xf32>
    %19 = arith.mulf %16, %18 : vector<4x256xf32>
    %20 = arith.addf %15, %19 : vector<4x256xf32>
    %c0_14 = arith.constant 0 : index
    %c1 = arith.constant 1 : index
    %21 = vector.load %arg15[%c0_14, %c1] : memref<4x384xf32, #tpu.memory_space<vmem>>, vector<4x256xf32>
    %22 = vector.extract_strided_slice %6 {offsets = [0, 1], sizes = [4, 1], strides = [1, 1]} : vector<4x9xf32> to vector<4x1xf32>
    %23 = vector.broadcast %22 : vector<4x1xf32> to vector<4x256xf32>
    %24 = arith.mulf %21, %23 : vector<4x256xf32>
    %c0_15 = arith.constant 0 : index
    %c17 = arith.constant 17 : index
    %25 = vector.load %arg15[%c0_15, %c17] : memref<4x384xf32, #tpu.memory_space<vmem>>, vector<4x256xf32>
    %26 = vector.extract_strided_slice %6 {offsets = [0, 4], sizes = [4, 1], strides = [1, 1]} : vector<4x9xf32> to vector<4x1xf32>
    %27 = vector.broadcast %26 : vector<4x1xf32> to vector<4x256xf32>
    %28 = arith.mulf %25, %27 : vector<4x256xf32>
    %29 = arith.addf %24, %28 : vector<4x256xf32>
    %c0_16 = arith.constant 0 : index
    %c33 = arith.constant 33 : index
    %30 = vector.load %arg15[%c0_16, %c33] : memref<4x384xf32, #tpu.memory_space<vmem>>, vector<4x256xf32>
    %31 = vector.extract_strided_slice %6 {offsets = [0, 7], sizes = [4, 1], strides = [1, 1]} : vector<4x9xf32> to vector<4x1xf32>
    %32 = vector.broadcast %31 : vector<4x1xf32> to vector<4x256xf32>
    %33 = arith.mulf %30, %32 : vector<4x256xf32>
    %34 = arith.addf %29, %33 : vector<4x256xf32>
    %c0_17 = arith.constant 0 : index
    %c2 = arith.constant 2 : index
    %35 = vector.load %arg15[%c0_17, %c2] : memref<4x384xf32, #tpu.memory_space<vmem>>, vector<4x256xf32>
    %36 = vector.extract_strided_slice %6 {offsets = [0, 2], sizes = [4, 1], strides = [1, 1]} : vector<4x9xf32> to vector<4x1xf32>
    %37 = vector.broadcast %36 : vector<4x1xf32> to vector<4x256xf32>
    %38 = arith.mulf %35, %37 : vector<4x256xf32>
    %c0_18 = arith.constant 0 : index
    %c18 = arith.constant 18 : index
    %39 = vector.load %arg15[%c0_18, %c18] : memref<4x384xf32, #tpu.memory_space<vmem>>, vector<4x256xf32>
    %40 = vector.extract_strided_slice %6 {offsets = [0, 5], sizes = [4, 1], strides = [1, 1]} : vector<4x9xf32> to vector<4x1xf32>
    %41 = vector.broadcast %40 : vector<4x1xf32> to vector<4x256xf32>
    %42 = arith.mulf %39, %41 : vector<4x256xf32>
    %43 = arith.addf %38, %42 : vector<4x256xf32>
    %c0_19 = arith.constant 0 : index
    %c34 = arith.constant 34 : index
    %44 = vector.load %arg15[%c0_19, %c34] : memref<4x384xf32, #tpu.memory_space<vmem>>, vector<4x256xf32>
    %45 = vector.extract_strided_slice %6 {offsets = [0, 8], sizes = [4, 1], strides = [1, 1]} : vector<4x9xf32> to vector<4x1xf32>
    %46 = vector.broadcast %45 : vector<4x1xf32> to vector<4x256xf32>
    %47 = arith.mulf %44, %46 : vector<4x256xf32>
    %48 = arith.addf %43, %47 : vector<4x256xf32>
    %c0_20 = arith.constant 0 : index
    %c0_21 = arith.constant 0 : index
    %49 = vector.load %arg4[%c0_20, %c0_21] : memref<1x256xf32, #tpu.memory_space<vmem>>, vector<1x256xf32>
    %50 = vector.broadcast %49 : vector<1x256xf32> to vector<4x256xf32>
    %51 = arith.mulf %20, %50 : vector<4x256xf32>
    %52 = arith.addf %51, %34 : vector<4x256xf32>
    %c0_22 = arith.constant 0 : index
    %c0_23 = arith.constant 0 : index
    %53 = vector.load %arg5[%c0_22, %c0_23] : memref<1x256xf32, #tpu.memory_space<vmem>>, vector<1x256xf32>
    %54 = vector.broadcast %53 : vector<1x256xf32> to vector<4x256xf32>
    %55 = arith.mulf %48, %54 : vector<4x256xf32>
    %56 = arith.addf %52, %55 : vector<4x256xf32>
    %c0_24 = arith.constant 0 : index
    %c0_25 = arith.constant 0 : index
    %57 = vector.load %arg7[%c0_24, %c0_25] : memref<4x1xf32, #tpu.memory_space<vmem>>, vector<4x1xf32>
    %58 = vector.broadcast %57 : vector<4x1xf32> to vector<4x256xf32>
    %59 = arith.addf %56, %58 : vector<4x256xf32>
    %c0_26 = arith.constant 0 : index
    %c0_27 = arith.constant 0 : index
    %60 = vector.load %arg10[%c0_26, %c0_27] : memref<4x1xf32, #tpu.memory_space<vmem>>, vector<4x1xf32>
    %c0_28 = arith.constant 0 : index
    %c0_29 = arith.constant 0 : index
    %61 = vector.load %arg11[%c0_28, %c0_29] : memref<4x1xf32, #tpu.memory_space<vmem>>, vector<4x1xf32>
    %c0_30 = arith.constant 0 : index
    %c0_31 = arith.constant 0 : index
    %62 = vector.load %arg8[%c0_30, %c0_31] : memref<4x4xf32, #tpu.memory_space<vmem>>, vector<4x4xf32>
    %cst = arith.constant dense<0.000000e+00> : vector<4x256xf32>
    %63 = tpu.matmul %62, %59, %cst {dimension_numbers = #tpu.dot_dimension_numbers<[1], [0], [0], [1], [0, 0, 1, 1], [], []>} : vector<4x4xf32>, vector<4x256xf32>, vector<4x256xf32> -> vector<4x256xf32>
    %c0_32 = arith.constant 0 : index
    %c0_33 = arith.constant 0 : index
    %64 = vector.load %arg9[%c0_32, %c0_33] : memref<4x1xf32, #tpu.memory_space<vmem>>, vector<4x1xf32>
    %65 = vector.broadcast %64 : vector<4x1xf32> to vector<4x256xf32>
    %66 = arith.addf %63, %65 : vector<4x256xf32>
    %cst_34 = arith.constant 0.000000e+00 : f32
    %67 = vector.broadcast %cst_34 : f32 to vector<4x256xf32>
    %68 = arith.maximumf %66, %67 : vector<4x256xf32>
    %cst_35 = arith.constant dense<0.000000e+00> : vector<256xf32>
    %69 = vector.multi_reduction <add>, %68, %cst_35 [0] : vector<4x256xf32> to vector<256xf32>
    %70 = vector.shape_cast %69 : vector<256xf32> to vector<1x256xf32>
    %cst_36 = arith.constant 2.500000e-01 : f32
    %71 = vector.broadcast %cst_36 : f32 to vector<1x256xf32>
    %72 = arith.mulf %70, %71 : vector<1x256xf32>
    %73 = vector.broadcast %72 : vector<1x256xf32> to vector<4x256xf32>
    %74 = arith.subf %68, %73 : vector<4x256xf32>
    %75 = arith.mulf %74, %74 : vector<4x256xf32>
    %cst_37 = arith.constant dense<0.000000e+00> : vector<256xf32>
    %76 = vector.multi_reduction <add>, %75, %cst_37 [0] : vector<4x256xf32> to vector<256xf32>
    %77 = vector.shape_cast %76 : vector<256xf32> to vector<1x256xf32>
    %cst_38 = arith.constant 2.500000e-01 : f32
    %78 = vector.broadcast %cst_38 : f32 to vector<1x256xf32>
    %79 = arith.mulf %77, %78 : vector<1x256xf32>
    %cst_39 = arith.constant 9.99999997E-7 : f32
    %80 = vector.broadcast %cst_39 : f32 to vector<1x256xf32>
    %81 = arith.addf %79, %80 : vector<1x256xf32>
    %82 = math.rsqrt %81 : vector<1x256xf32>
    %83 = vector.broadcast %82 : vector<1x256xf32> to vector<4x256xf32>
    %84 = arith.mulf %74, %83 : vector<4x256xf32>
    %85 = vector.broadcast %60 : vector<4x1xf32> to vector<4x256xf32>
    %86 = arith.mulf %85, %84 : vector<4x256xf32>
    %87 = vector.broadcast %61 : vector<4x1xf32> to vector<4x256xf32>
    %88 = arith.addf %86, %87 : vector<4x256xf32>
    %c0_40 = arith.constant 0 : index
    %c0_41 = arith.constant 0 : index
    %89 = vector.load %arg12[%c0_40, %c0_41] : memref<4x4xf32, #tpu.memory_space<vmem>>, vector<4x4xf32>
    %cst_42 = arith.constant dense<0.000000e+00> : vector<4x256xf32>
    %90 = tpu.matmul %89, %88, %cst_42 {dimension_numbers = #tpu.dot_dimension_numbers<[1], [0], [0], [1], [0, 0, 1, 1], [], []>} : vector<4x4xf32>, vector<4x256xf32>, vector<4x256xf32> -> vector<4x256xf32>
    %c0_43 = arith.constant 0 : index
    %c0_44 = arith.constant 0 : index
    %91 = vector.load %arg13[%c0_43, %c0_44] : memref<4x1xf32, #tpu.memory_space<vmem>>, vector<4x1xf32>
    %92 = vector.broadcast %91 : vector<4x1xf32> to vector<4x256xf32>
    %93 = arith.addf %90, %92 : vector<4x256xf32>
    %cst_45 = arith.constant 0.000000e+00 : f32
    %94 = vector.broadcast %cst_45 : f32 to vector<4x256xf32>
    %95 = arith.maximumf %93, %94 : vector<4x256xf32>
    %cst_46 = arith.constant dense<0.000000e+00> : vector<256xf32>
    %96 = vector.multi_reduction <add>, %95, %cst_46 [0] : vector<4x256xf32> to vector<256xf32>
    %97 = vector.shape_cast %96 : vector<256xf32> to vector<1x256xf32>
    %cst_47 = arith.constant 2.500000e-01 : f32
    %98 = vector.broadcast %cst_47 : f32 to vector<1x256xf32>
    %99 = arith.mulf %97, %98 : vector<1x256xf32>
    %100 = vector.broadcast %99 : vector<1x256xf32> to vector<4x256xf32>
    %101 = arith.subf %95, %100 : vector<4x256xf32>
    %102 = arith.mulf %101, %101 : vector<4x256xf32>
    %cst_48 = arith.constant dense<0.000000e+00> : vector<256xf32>
    %103 = vector.multi_reduction <add>, %102, %cst_48 [0] : vector<4x256xf32> to vector<256xf32>
    %104 = vector.shape_cast %103 : vector<256xf32> to vector<1x256xf32>
    %cst_49 = arith.constant 2.500000e-01 : f32
    %105 = vector.broadcast %cst_49 : f32 to vector<1x256xf32>
    %106 = arith.mulf %104, %105 : vector<1x256xf32>
    %cst_50 = arith.constant 9.99999997E-7 : f32
    %107 = vector.broadcast %cst_50 : f32 to vector<1x256xf32>
    %108 = arith.addf %106, %107 : vector<1x256xf32>
    %109 = math.rsqrt %108 : vector<1x256xf32>
    %110 = vector.broadcast %109 : vector<1x256xf32> to vector<4x256xf32>
    %111 = arith.mulf %101, %110 : vector<4x256xf32>
    %112 = vector.broadcast %60 : vector<4x1xf32> to vector<4x256xf32>
    %113 = arith.mulf %112, %111 : vector<4x256xf32>
    %114 = vector.broadcast %61 : vector<4x1xf32> to vector<4x256xf32>
    %115 = arith.addf %113, %114 : vector<4x256xf32>
    %c0_51 = arith.constant 0 : index
    %c0_52 = arith.constant 0 : index
    %c0_53 = arith.constant 0 : index
    %116 = vector.load %arg14[%c0_51, %c0_52, %c0_53] : memref<1x4x256xf32, #tpu.memory_space<vmem>>, vector<1x4x256xf32>
    %117 = vector.shape_cast %116 : vector<1x4x256xf32> to vector<4x256xf32>
    %118 = vector.shape_cast %115 : vector<4x256xf32> to vector<1x4x256xf32>
    tpu.vector_store %arg14[%c0_51, %c0_52, %c0_53], %118 {strides = array<i32>} : memref<1x4x256xf32, #tpu.memory_space<vmem>>, vector<1x4x256xf32>,
    return
  }
  func.func @transform_0(%arg0: i32, %arg1: i32) -> (i32, i32, i32) {
    %c0_i32 = arith.constant 0 : i32
    %c0_i32_0 = arith.constant 0 : i32
    return %arg0, %c0_i32, %arg1 : i32, i32, i32
  }
  func.func @transform_1(%arg0: i32, %arg1: i32) -> (i32, i32, i32) {
    %c1_i32 = arith.constant 1 : i32
    %0 = arith.addi %arg1, %c1_i32 : i32
    %c2_i32 = arith.constant 2 : i32
    %1 = arith.muli %0, %c2_i32 : i32
    %c0_i32 = arith.constant 0 : i32
    %c0_i32_0 = arith.constant 0 : i32
    return %arg0, %c0_i32, %1 : i32, i32, i32
  }
  func.func @transform_2(%arg0: i32, %arg1: i32) -> (i32, i32) {
    %c0_i32 = arith.constant 0 : i32
    %c0_i32_0 = arith.constant 0 : i32
    return %c0_i32, %arg1 : i32, i32
  }
  func.func @transform_3(%arg0: i32, %arg1: i32) -> (i32, i32) {
    %c0_i32 = arith.constant 0 : i32
    %c0_i32_0 = arith.constant 0 : i32
    return %c0_i32, %arg1 : i32, i32
  }
  func.func @transform_4(%arg0: i32, %arg1: i32) -> (i32, i32) {
    %c0_i32 = arith.constant 0 : i32
    %c0_i32_0 = arith.constant 0 : i32
    %c0_i32_1 = arith.constant 0 : i32
    return %c0_i32, %c0_i32_0 : i32, i32
  }
  func.func @transform_5(%arg0: i32, %arg1: i32) -> (i32, i32) {
    %c0_i32 = arith.constant 0 : i32
    %c0_i32_0 = arith.constant 0 : i32
    %c0_i32_1 = arith.constant 0 : i32
    return %c0_i32, %c0_i32_0 : i32, i32
  }
  func.func @transform_6(%arg0: i32, %arg1: i32) -> (i32, i32) {
    %c0_i32 = arith.constant 0 : i32
    %c0_i32_0 = arith.constant 0 : i32
    %c0_i32_1 = arith.constant 0 : i32
    return %c0_i32, %c0_i32_0 : i32, i32
  }
  func.func @transform_7(%arg0: i32, %arg1: i32) -> (i32, i32) {
    %c0_i32 = arith.constant 0 : i32
    %c0_i32_0 = arith.constant 0 : i32
    %c0_i32_1 = arith.constant 0 : i32
    return %c0_i32, %c0_i32_0 : i32, i32
  }
  func.func @transform_8(%arg0: i32, %arg1: i32) -> (i32, i32) {
    %c0_i32 = arith.constant 0 : i32
    %c0_i32_0 = arith.constant 0 : i32
    %c0_i32_1 = arith.constant 0 : i32
    return %c0_i32, %c0_i32_0 : i32, i32
  }
  func.func @transform_9(%arg0: i32, %arg1: i32) -> (i32, i32) {
    %c0_i32 = arith.constant 0 : i32
    %c0_i32_0 = arith.constant 0 : i32
    %c0_i32_1 = arith.constant 0 : i32
    return %c0_i32, %c0_i32_0 : i32, i32
  }
  func.func @transform_10(%arg0: i32, %arg1: i32) -> (i32, i32) {
    %c0_i32 = arith.constant 0 : i32
    %c0_i32_0 = arith.constant 0 : i32
    %c0_i32_1 = arith.constant 0 : i32
    return %c0_i32, %c0_i32_0 : i32, i32
  }
  func.func @transform_11(%arg0: i32, %arg1: i32) -> (i32, i32) {
    %c0_i32 = arith.constant 0 : i32
    %c0_i32_0 = arith.constant 0 : i32
    %c0_i32_1 = arith.constant 0 : i32
    return %c0_i32, %c0_i32_0 : i32, i32
  }
  func.func @transform_12(%arg0: i32, %arg1: i32) -> (i32, i32, i32) {
    %c0_i32 = arith.constant 0 : i32
    %c0_i32_0 = arith.constant 0 : i32
    return %arg0, %c0_i32, %arg1 : i32, i32, i32
  }
}

</mosaic_0001>

<bundles_post_ra>
// kernel: local_feature_block.1
= control target key start
LH: loop header
LB: loop body
LE: loop exit
PB: predicated region body
PF: predicated region fallthrough
CT: control target
= control target key end

     0   :  { %s1361_s21 = smov 0   ;;  %s1363_s22 = smov 0   ;;  %s1536_s0 = inlined_call_operand.vmem [shape: f32[2,4,512], index: 0, kind: input, shape index: {}, may-alias: {0,1}]   ;;  %s1537_s1 = inlined_call_operand.vmem [shape: f32[2,4,512], index: 1, kind: input, shape index: {}, may-alias: {0,1}]   ;;  %s1538_s2 = inlined_call_operand.vmem [shape: f32[1,256], index: 2, kind: input, shape index: {}]   ;;  %s1539_s3 = inlined_call_operand.vmem [shape: f32[1,256], index: 3, kind: input, shape index: {}]   ;;  %s1540_s4 = inlined_call_operand.vmem [shape: f32[4,9], index: 4, kind: input, shape index: {}]   ;;  %s1541_s5 = inlined_call_operand.vmem [shape: f32[4,1], index: 5, kind: input, shape index: {}]   ;;  %s1542_s6 = inlined_call_operand.vmem [shape: f32[4,4], index: 6, kind: input, shape index: {}]   ;;  %s1543_s7 = inlined_call_operand.vmem [shape: f32[4,1], index: 7, kind: input, shape index: {}]   ;;  %s1544_s8 = inlined_call_operand.vmem [shape: f32[4,1], index: 8, kind: input, shape index: {}]   ;;  %s1545_s9 = inlined_call_operand.vmem [shape: f32[4,1], index: 9, kind: input, shape index: {}]   ;;  %s1546_s10 = inlined_call_operand.vmem [shape: f32[4,4], index: 10, kind: input, shape index: {}]   ;;  %s1547_s11 = inlined_call_operand.vmem [shape: f32[4,1], index: 11, kind: input, shape index: {}]   ;;  %s1548_s12 = inlined_call_operand.vmem [shape: f32[2,4,256], index: 12, kind: output, shape index: {}]  }
   0x1   :  { %s1365_s23 = smov 0  }
   0x2 LB: > { %s34_s24 = sadd.s32 1, %s1275_s22  ;;  %p1177_p0 = scmp.ge.s32.totalorder %s1279_s23, 1  ;;  %s1279_s23 = sphi %s1365_s23, %s22_s23   ;;  %s1275_s22 = sphi %s1363_s22, %s1550_s22   ;;  %s1271_s21 = sphi %s1361_s21, %s1549_s21  }
   0x3   : > { %p36_p1 = scmp.ge.s32.totalorder %s34_s24, 2  ;;  %p426_p2 = scmp.lt.s32.totalorder %s1279_s23, 3 }
   0x5   : > { %s1552_s24 = smov (%p36_p1, %s34_s24), 0  ;;  %p427_p3 = pnand %p1177_p0, %p426_p2 }
   0x6   : > { %p495_p4 = scmp.lt.s32.totalorder (!%p427_p3), %s1271_s21, 1  ;;  %s1291_s17 = smov (!%p427_p3), 112  }
   0x7   : > { %430 = sbr.rel (%p427_p3) target bundleno = 788 (0x314), region = 68  ;;  %s1292_s18 = smov (!%p427_p3), 96  }
   0x8   : > { %s1293_s25 = smov (!%p427_p3), 2   ;;  %s1294_s26 = smov (!%p427_p3), 127  }
   0x9   : > { %s1295_s29 = smov (!%p427_p3), 126  }
   0xc   : > { %v1384_v0 = vld [vmem:[%s1540_s4] sm:$0xf]  ;;  %v1281_v1 = vmov 7   ;;  %v1282_v2 = vmov 4   ;;  %v1283_v3 = vmov 3   ;;  %v1284_v4 = vmov 5  }
   0xd   : > { %1240 = vset.pattern.permute.xlu1 %v1281_v1  ;;  %1238 = vset.pattern.permute.xlu0 %v1282_v2  ;;  %v1285_v5 = vmov 8   ;;  %v1286_v6 = vmov 6   ;;  %v1287_v7 = vmov 1   ;;  %v1288_v8 = vmov 2   ;;  %s1554_s21 = smov (!%p495_p4, %s1271_s21), 1 }
   0xe   : > { %636 = vperm.xlu1 %1240, %v1384_v0   ;;  %612 = vperm.xlu0 %1238, %v1384_v0   ;;  %s1194_s27 = sshll.u32 %s1554_s21, 4  ;;  %v1289_v11 = vmov 839922192   ;;  %v1290_v14 = vmov 0   ;;  %v738_v32 = vld [vmem:[%s1539_s3] sm:$0x3] }
   0xf   : > { %1242 = vset.pattern.permute.xlu2 %v1283_v3  ;;  %s1196_s28 = sadd.s32 8, %s1194_s27  ;;  %s502_s16 = scalar_lea.vmem %s1536_s0, %s1194_s27  ;;  %v547_v12 = vunpack.c.l.s4 %v1289_v11  ;;  %v741_v33 = vperm.slane %v738_v32, 1  ;;  %v740_v38 = vperm.slane %v738_v32, 0  ;;  %vm572_vm0 = vcmask 1043456   ;;  %v777_v32 = vld [vmem:[%s1544_s8] sm:$0xf] }
  0x10   : > { %555 = vperm.xlu2 %1242, %v1384_v0   ;;  %s513_s13 = scalar_lea.vmem %s1537_s1, %s1196_s28  ;;  %v1405_v10 = vld [vmem:[%s502_s16] sm:$0xff]  ;;  %vm574_vm1 = vcmask 916480   ;;  %vm597_vm2 = vcmask 785408   ;;  %vm747_vm3 = vcmask 15360   ;;  %vm734_vm4 = vcmask 1039360   ;;  %s1197_s30 = sshll.u32 %s1554_s21, 3 }
  0x11   : > { %v538_v9 = vld [vmem:[%s513_s13] sm:$0xf]  ;;  %v1407_v13 = vunpack.c.0.s8 %v547_v12  ;;  %v742_v39 = vrot.slane %v741_v33, 4  ;;  %vm762_vm5 = vcmask 1031168   ;;  %vm790_vm6 = vcmask 31744   ;;  %s534_s15 = scalar_lea.vmem %s1548_s12, %s1197_s30 }
  0x12   : > { %539 = vst [vmem:[#allocation2 + $0x8] sm:$0xf] %v538_v9  ;;  %v766_v12 = vld [vmem:[%s1541_s5] sm:$0xf] }
  0x13   : > { %v743_v41 = vsel %vm572_vm0, %v740_v38, %v742_v39 }
  0x16   : > { %1239 = vset.pattern.permute.xlu0 %v1284_v4  ;;  %1241 = vset.pattern.permute.xlu1 %v1285_v5 }
  0x17   : > { %670 = vperm.xlu0 %1239, %v1384_v0   ;;  %694 = vperm.xlu1 %1241, %v1384_v0  }
  0x18   : > { %1243 = vset.pattern.permute.xlu2 %v1286_v6 }
  0x19   : > { %579 = vperm.xlu2 %1243, %v1384_v0   ;;  %v1409_v16 = vld [vmem:[#allocation2 + $0x8] sm:$0xf] }
  0x1f   : > { %1244 = vset.pattern.permute.xlu1 %v1287_v7  ;;  %1246 = vset.pattern.permute.xlu0 %v1290_v14 }
  0x20   : > { %602 = vperm.xlu1 %1244, %v1384_v0  }
  0x21   : > { %1248 = vset.pattern.permute.xlu2 %v1290_v14 }
  0x28   : > { %1245 = vset.pattern.permute.xlu1 %v1288_v8 }
  0x29   : > { %660 = vperm.xlu1 %1245, %v1384_v0  }
  0x31   : > { %1247 = vset.pattern.permute.xlu1 %v1290_v14 }
  0x6a   : > { %v556_v27 = vpop.permute.xlu2 %555 }
  0x6b   : > { %v560_v31 = vperm.slane %v556_v27, %v1407_v13 }
  0x6d   : > { %v562_v34 = vmul.f32 %v560_v31, %v1405_v10  ;;  %v563_v43 = vmul.f32 %v560_v31, %v1409_v16 }
  0x73   : > { %v580_v37 = vpop.permute.xlu2 %579 }
  0x74   : > { %v584_v40 = vperm.slane %v580_v37, %v1407_v13 }
  0x76   : > { %v586_v42 = vmul.f32 %v584_v40, %v1405_v10  ;;  %v587_v44 = vmul.f32 %v584_v40, %v1409_v16 }
  0x80   : > { %v637_v15 = vpop.permute.xlu1 %636  ;;  %v613_v17 = vpop.permute.xlu0 %612 }
  0x81   : > { %v641_v18 = vperm.slane %v637_v15, %v1407_v13  ;;  %v617_v19 = vperm.slane %v613_v17, %v1407_v13 }
  0x83   : > { %v643_v20 = vmul.f32 %v641_v18, %v1405_v10  ;;  %v619_v21 = vmul.f32 %v617_v19, %v1405_v10  ;;  %v620_v22 = vmul.f32 %v617_v19, %v1409_v16  ;;  %v644_v35 = vmul.f32 %v641_v18, %v1409_v16 }
  0x85   : > { %625 = vrot.lane.b32.xlu0 %v620_v22, %s1291_s17  ;;  %647 = vrot.lane.b32.xlu1 %v643_v20, %s1292_s18 }
  0x86   : > { %623 = vrot.lane.b32.xlu2 %v619_v21, %s1291_s17 }
  0x89   : > { %v671_v23 = vpop.permute.xlu0 %670  ;;  %v695_v24 = vpop.permute.xlu1 %694 }
  0x8a   : > { %v675_v25 = vperm.slane %v671_v23, %v1407_v13  ;;  %v699_v26 = vperm.slane %v695_v24, %v1407_v13  ;;  %v778_v24 = vld [vmem:[%s1545_s9] sm:$0xf] }
  0x8c   : > { %v677_v28 = vmul.f32 %v675_v25, %v1405_v10  ;;  %v678_v29 = vmul.f32 %v675_v25, %v1409_v16  ;;  %v702_v30 = vmul.f32 %v699_v26, %v1409_v16  ;;  %v701_v36 = vmul.f32 %v699_v26, %v1405_v10 }
  0x8e   : > { %683 = vrot.lane.b32.xlu0 %v678_v29, %s1291_s17  ;;  %681 = vrot.lane.b32.xlu2 %v677_v28, %s1291_s17 }
  0x8f   : > { %707 = vrot.lane.b32.xlu1 %v702_v30, %s1292_s18 }
  0x92   : > { %v603_v46 = vpop.permute.xlu1 %602 }
  0x93   : > { %v607_v49 = vperm.slane %v603_v46, %v1407_v13 }
  0x95   : > { %v610_v51 = vmul.f32 %v607_v49, %v1409_v16  ;;  %v609_v59 = vmul.f32 %v607_v49, %v1405_v10  ;;  %v717_v49 = vld [vmem:[%s1538_s2] sm:$0x3] }
  0x96   : > { %705 = vrot.lane.b32.xlu0 %v701_v36, %s1292_s18  ;;  %649 = vrot.lane.b32.xlu2 %v644_v35, %s1292_s18 }
  0x97   : > { %566 = vrot.lane.b32.xlu1 %v562_v34, %s1291_s17 }
  0x9b   : > { %v661_v48 = vpop.permute.xlu1 %660 }
  0x9c   : > { %v665_v63 = vperm.slane %v661_v48, %v1407_v13  ;;  %v780_v48 = vld [vmem:[%s1543_s7] sm:$0xf] }
  0x9e   : > { %744 = vrot.lane.b32.xlu2 %v743_v41, %s1293_s25  ;;  %544 = vperm.xlu0 %1246, %v1384_v0   ;;  %v668_v5 = vmul.f32 %v665_v63, %v1409_v16  ;;  %v667_v21 = vmul.f32 %v665_v63, %v1405_v10 }
  0x9f   : > { %590 = vrot.lane.b32.xlu1 %v586_v42, %s1292_s18 }
  0xa6   : > { %568 = vrot.lane.b32.xlu2 %v563_v43, %s1291_s17 }
  0xae   : > { %592 = vrot.lane.b32.xlu2 %v587_v44, %s1292_s18 }
  0xe0   : > { %v624_v45 = vpop.permute.xlu2 %623 }
  0xe1   : > { %v627_v52 = vrot.slane %v624_v45, 4 }
  0xe8   : > { %v682_v47 = vpop.permute.xlu2 %681 }
  0xe9   : > { %v685_v14 = vrot.slane %v682_v47, 4 }
  0xf0   : > { %v650_v50 = vpop.permute.xlu2 %649 }
  0xf1   : > { %v652_v55 = vrot.slane %v650_v50, 4 }
  0xf7   : > { %v626_v53 = vpop.permute.xlu0 %625  ;;  %v648_v54 = vpop.permute.xlu1 %647 }
  0xf8   : > { %v628_v56 = vrot.slane %v626_v53, 4  ;;  %v634_v57 = vadd.f32 %v626_v53, %v610_v51  ;;  %v651_v58 = vrot.slane %v648_v54, 4  ;;  %v745_v1 = vpop.permute.xlu2 %744 }
  0xf9   : > { %v746_v9 = vrot.slane %v745_v1, 4 }
  0xfa   : > { %v629_v60 = vsel %vm572_vm0, %v627_v52, %v628_v56  ;;  %v658_v61 = vadd.f32 %v650_v50, %v634_v57  ;;  %v653_v62 = vsel %vm572_vm0, %v651_v58, %v652_v55  ;;  %v720_v50 = vperm.slane %v717_v49, 1 }
  0xfb   : > { %v630_v0 = vsel %vm574_vm1, %v624_v45, %v629_v60  ;;  %v654_v3 = vsel %vm597_vm2, %v648_v54, %v653_v62  ;;  %v748_v34 = vsel %vm747_vm3, %v746_v9, %v745_v1  ;;  %v719_v54 = vperm.slane %v717_v49, 0 }
  0xfc   : > { %v633_v2 = vadd.f32 %v630_v0, %v609_v59  ;;  %729 = vrot.lane.b32.xlu1 %v658_v61, %s1294_s26  ;;  %v721_v55 = vrot.slane %v720_v50, 4 }
  0xfe   : > { %v657_v4 = vadd.f32 %v654_v3, %v633_v2  ;;  %v722_v59 = vsel %vm572_vm0, %v719_v54, %v721_v55 }
 0x100   : > { %v684_v6 = vpop.permute.xlu0 %683  ;;  %727 = vrot.lane.b32.xlu0 %v657_v4, %s1294_s26  ;;  %v569_v17 = vpop.permute.xlu2 %568 }
 0x101   : > { %v686_v7 = vrot.slane %v684_v6, 4  ;;  %v692_v8 = vadd.f32 %v684_v6, %v668_v5  ;;  %v708_v11 = vpop.permute.xlu1 %707  ;;  %v571_v28 = vrot.slane %v569_v17, 4 }
 0x102   : > { %v710_v22 = vrot.slane %v708_v11, 4 }
 0x103   : > { %v716_v15 = vadd.f32 %v708_v11, %v692_v8  ;;  %v687_v18 = vsel %vm572_vm0, %v685_v14, %v686_v7  ;;  %v779_v8 = vld [vmem:[%s1542_s6] sm:$0xf] }
 0x104   : > { %769 = vperm.xlu1 %1247, %v766_v12   ;;  %v688_v16 = vsel %vm574_vm1, %v682_v47, %v687_v18 }
 0x105   : > { %v752_v19 = vmul.f32 %v746_v9, %v716_v15  ;;  %v691_v26 = vadd.f32 %v688_v16, %v667_v21 }
 0x108   : > { %v706_v20 = vpop.permute.xlu0 %705  ;;  %757 = vrot.lane.b32.xlu0 %v752_v19, %s1295_s29  ;;  %v593_v33 = vpop.permute.xlu2 %592 }
 0x109   : > { %v709_v23 = vrot.slane %v706_v20, 4  ;;  %v567_v25 = vpop.permute.xlu1 %566  ;;  %v595_v38 = vrot.slane %v593_v33, 4 }
 0x10a   : > { %v570_v29 = vrot.slane %v567_v25, 4 }
 0x10b   : > { %v711_v27 = vsel %vm572_vm0, %v709_v23, %v710_v22 }
 0x10c   : > { %v712_v30 = vsel %vm597_vm2, %v706_v20, %v711_v27  ;;  %909 = vperm.xlu1 %1247, %v778_v24   ;;  %v573_v36 = vsel %vm572_vm0, %v570_v29, %v571_v28 }
 0x10d   : > { %v715_v31 = vadd.f32 %v712_v30, %v691_v26  ;;  %v575_v41 = vsel %vm574_vm1, %v567_v25, %v573_v36 }
 0x10f   : > { %v751_v35 = vmul.f32 %v748_v34, %v715_v31 }
 0x110   : > { %902 = vperm.xlu0 %1246, %v777_v32   ;;  %v545_v37 = vpop.permute.xlu0 %544 }
 0x111   : > { %755 = vrot.lane.b32.xlu2 %v751_v35, %s1295_s29  ;;  %v549_v39 = vperm.slane %v545_v37, %v1407_v13  ;;  %v591_v40 = vpop.permute.xlu1 %590 }
 0x112   : > { %v594_v42 = vrot.slane %v591_v40, 4 }
 0x113   : > { %v551_v43 = vmul.f32 %v549_v39, %v1405_v10  ;;  %v915_v10 = vld [vmem:[%s1547_s11] sm:$0xf] }
 0x114   : > { %v596_v44 = vsel %vm572_vm0, %v594_v42, %v595_v38 }
 0x115   : > { %v577_v45 = vadd.f32 %v575_v41, %v551_v43  ;;  %v598_v46 = vsel %vm597_vm2, %v591_v40, %v596_v44 }
 0x117   : > { %v600_v47 = vadd.f32 %v598_v46, %v577_v45 }
 0x119   : > { %783 = vperm.xlu2 %1248, %v780_v48   ;;  %v724_v63 = vmul.f32 %v722_v59, %v600_v47 }
 0x121   : > { %918 = vperm.xlu2 %1248, %v915_v10  }
 0x16b   : > { %v756_v58 = vpop.permute.xlu2 %755 }
 0x16c   : > { %v759_v62 = vrot.slane %v756_v58, 4 }
 0x16e   : > { %v730_v51 = vpop.permute.xlu1 %729 }
 0x16f   : > { %v732_v56 = vrot.slane %v730_v51, 4 }
 0x172   : > { %v728_v52 = vpop.permute.xlu0 %727 }
 0x173   : > { %v731_v53 = vrot.slane %v728_v52, 4 }
 0x175   : > { %v733_v57 = vsel %vm572_vm0, %v731_v53, %v732_v56 }
 0x176   : > { %v735_v60 = vsel %vm734_vm4, %v728_v52, %v733_v57  ;;  %v770_v1 = vpop.permute.xlu1 %769 }
 0x177   : > { %v737_v2 = vadd.f32 %v735_v60, %v724_v63  ;;  %v774_v3 = vperm.slane %v770_v1, %v1407_v13  ;;  %v784_v13 = vpop.permute.xlu2 %783 }
 0x17a   : > { %v758_v61 = vpop.permute.xlu0 %757 }
 0x17b   : > { %v760_v0 = vrot.slane %v758_v61, 4 }
 0x17d   : > { %v761_v4 = vsel %vm572_vm0, %v759_v62, %v760_v0 }
 0x17e   : > { %v763_v5 = vsel %vm762_vm5, %v756_v58, %v761_v4 }
 0x17f   : > { %v765_v6 = vadd.f32 %v763_v5, %v737_v2 }
 0x181   : > { %v776_v7 = vadd.f32 %v774_v3, %v765_v6 }
 0x183   : > { %787 = vst [vmem:[#allocation1] ss:$2 sm:$0xff] %v776_v7  ;;  %v1499_v7 = vpop.permute.xlu0 %902 }
 0x18a   : > { %v788_v9 = vld.sshfl [vmem:[#allocation1] sm:$0xff pattern:$0x75316420]  ;;  %v789_v11 = vld.sshfl [vmem:[#allocation1 + $0x8] sm:$0xff pattern:$0x75316420] }
 0x18b   : > { %1184 = vmatpush.msk.msra.mxu0 %vm572_vm0, %v788_v9  ;;  %1186 = vmatpush.msk.msra.mxu1 %vm572_vm0, %v789_v11  ;;  %v1502_v11 = vpop.permute.xlu1 %909 }
 0x18c   : > { %1185 = vmatmul.msk.f32.vlgmr.msra.gmra.mxu0 %vm790_vm6, %v779_v8  ;;  %1187 = vmatmul.msk.f32.vlgmr.msra.gmra.mxu1 %vm790_vm6, %v779_v8 }
 0x209   : > { %v815_v12 = vpop.f32.mrf.mxu0  ;;  %v835_v14 = vpop.f32.mrf.mxu1 }
 0x20a   : > { %v816_v15 = vadd.f32 %v815_v12, %v784_v13  ;;  %v836_v17 = vadd.f32 %v835_v14, %v784_v13  ;;  %v914_v14 = vld [vmem:[%s1546_s10] sm:$0xf] }
 0x20c   : > { %v838_v18 = vmax.f32 %v816_v15, 0.0  ;;  %v839_v19 = vmax.f32 %v836_v17, 0.0  ;;  %v919_v17 = vpop.permute.xlu2 %918 }
 0x20e   : > { %v840_v20 = vsel %vm572_vm0, %v838_v18, 0.0  ;;  %v847_v16 = vsel %vm572_vm0, %v839_v19, 0.0 }
 0x20f   : > { %v841_v21 = vrot.slane %v840_v20, 4  ;;  %v848_v22 = vrot.slane %v847_v16, 4 }
 0x211   : > { %v842_v23 = vadd.f32 %v841_v21, %v840_v20  ;;  %v849_v24 = vadd.f32 %v848_v22, %v847_v16 }
 0x213   : > { %v843_v25 = vrot.slane %v842_v23, 2  ;;  %v850_v26 = vrot.slane %v849_v24, 2 }
 0x215   : > { %v844_v27 = vadd.f32 %v843_v25, %v842_v23  ;;  %v851_v28 = vadd.f32 %v850_v26, %v849_v24 }
 0x217   : > { %v845_v29 = vrot.slane %v844_v27, 1  ;;  %v852_v30 = vrot.slane %v851_v28, 1 }
 0x219   : > { %v846_v31 = vadd.f32 %v845_v29, %v844_v27  ;;  %v853_v32 = vadd.f32 %v852_v30, %v851_v28 }
 0x21b   : > { %v854_v33 = vmul.f32 0.25, %v846_v31  ;;  %v855_v34 = vmul.f32 0.25, %v853_v32 }
 0x21d   : > { %v856_v35 = vsub.f32 %v838_v18, %v854_v33  ;;  %v857_v36 = vsub.f32 %v839_v19, %v855_v34 }
 0x21f   : > { %v858_v37 = vmul.f32 %v856_v35, %v856_v35  ;;  %v859_v38 = vmul.f32 %v857_v36, %v857_v36 }
 0x221   : > { %v860_v39 = vsel %vm572_vm0, %v858_v37, 0.0  ;;  %v867_v40 = vsel %vm572_vm0, %v859_v38, 0.0 }
 0x222   : > { %v861_v41 = vrot.slane %v860_v39, 4  ;;  %v868_v42 = vrot.slane %v867_v40, 4 }
 0x224   : > { %v862_v43 = vadd.f32 %v861_v41, %v860_v39  ;;  %v869_v44 = vadd.f32 %v868_v42, %v867_v40 }
 0x226   : > { %v863_v45 = vrot.slane %v862_v43, 2  ;;  %v870_v46 = vrot.slane %v869_v44, 2 }
 0x228   : > { %v864_v47 = vadd.f32 %v863_v45, %v862_v43  ;;  %v871_v48 = vadd.f32 %v870_v46, %v869_v44 }
 0x22a   : > { %v865_v49 = vrot.slane %v864_v47, 1  ;;  %v872_v50 = vrot.slane %v871_v48, 1 }
 0x22c   : > { %v866_v51 = vadd.f32 %v865_v49, %v864_v47  ;;  %v873_v52 = vadd.f32 %v872_v50, %v871_v48 }
 0x22e   : > { %v874_v10 = vmul.f32 0.25, %v866_v51  ;;  %v875_v53 = vmul.f32 0.25, %v873_v52 }
 0x230   : > { %v876_v54 = vadd.f32 1e-06, %v874_v10  ;;  %v877_v55 = vadd.f32 1e-06, %v875_v53 }
 0x232   : > { %1249 = vrsqrt.f32 %v876_v54  ;;  %vm884_vm9 = vweird.f32 %v876_v54  ;;  %vm894_vm11 = vweird.f32 %v877_v55 }
 0x233   : > { %1251 = vrsqrt.f32 %v877_v55 }
 0x238   : > { %v1250_v56 = vpop.eup %1249 }
 0x239   : > { %v1252_v57 = vpop.eup %1251  ;;  %v879_v58 = vmul.f32 %v1250_v56, %v876_v54  ;;  %vm885_vm7 = vweird.f32 %v1250_v56 }
 0x23a   : > { %v889_v59 = vmul.f32 %v1252_v57, %v877_v55  ;;  %vm895_vm8 = vweird.f32 %v1252_v57  ;;  %vm886_vm10 = vmor %vm884_vm9, %vm885_vm7 }
 0x23b   : > { %v880_v60 = vmul.f32 %v1250_v56, %v879_v58  ;;  %vm896_vm12 = vmor %vm894_vm11, %vm895_vm8 }
 0x23c   : > { %v890_v61 = vmul.f32 %v1252_v57, %v889_v59 }
 0x23d   : > { %v881_v62 = vmul.f32 0.5, %v880_v60 }
 0x23e   : > { %v891_v63 = vmul.f32 0.5, %v890_v61 }
 0x23f   : > { %v882_v0 = vsub.f32 1.5, %v881_v62 }
 0x240   : > { %v892_v1 = vsub.f32 1.5, %v891_v63 }
 0x241   : > { %v883_v2 = vmul.f32 %v1250_v56, %v882_v0 }
 0x242   : > { %v893_v3 = vmul.f32 %v1252_v57, %v892_v1 }
 0x243   : > { %v887_v4 = vsel %vm886_vm10, %v1250_v56, %v883_v2 }
 0x244   : > { %v898_v5 = vmul.f32 %v887_v4, %v856_v35  ;;  %v897_v6 = vsel %vm896_vm12, %v1252_v57, %v893_v3 }
 0x245   : > { %v899_v8 = vmul.f32 %v897_v6, %v857_v36 }
 0x246   : > { %v905_v9 = vmul.f32 %v1499_v7, %v898_v5 }
 0x247   : > { %v906_v13 = vmul.f32 %v1499_v7, %v899_v8 }
 0x248   : > { %v912_v12 = vadd.f32 %v1502_v11, %v905_v9 }
 0x249   : > { %v913_v15 = vadd.f32 %v1502_v11, %v906_v13 }
 0x24a   : > { %1188 = vmatpush.msk.msra.mxu2 %vm572_vm0, %v912_v12 }
 0x24b   : > { %1190 = vmatpush.msk.msra.mxu3 %vm572_vm0, %v913_v15  ;;  %1189 = vmatmul.msk.f32.vlgmr.msra.gmra.mxu2 %vm790_vm6, %v914_v14 }
 0x24c   : > { %1191 = vmatmul.msk.f32.vlgmr.msra.gmra.mxu3 %vm790_vm6, %v914_v14 }
 0x2ce   : > { %v947_v18 = vpop.f32.mrf.mxu2 }
 0x2cf   : > { %v948_v19 = vadd.f32 %v947_v18, %v919_v17  ;;  %v967_v20 = vpop.f32.mrf.mxu3 }
 0x2d0   : > { %v968_v16 = vadd.f32 %v967_v20, %v919_v17 }
 0x2d1   : > { %v970_v21 = vmax.f32 %v948_v19, 0.0 }
 0x2d2   : > { %v971_v22 = vmax.f32 %v968_v16, 0.0 }
 0x2d3   : > { %v972_v23 = vsel %vm572_vm0, %v970_v21, 0.0 }
 0x2d4   : > { %v973_v24 = vrot.slane %v972_v23, 4  ;;  %v979_v25 = vsel %vm572_vm0, %v971_v22, 0.0 }
 0x2d5   : > { %v980_v26 = vrot.slane %v979_v25, 4 }
 0x2d6   : > { %v974_v27 = vadd.f32 %v973_v24, %v972_v23 }
 0x2d7   : > { %v981_v28 = vadd.f32 %v980_v26, %v979_v25 }
 0x2d8   : > { %v975_v29 = vrot.slane %v974_v27, 2 }
 0x2d9   : > { %v982_v30 = vrot.slane %v981_v28, 2 }
 0x2da   : > { %v976_v31 = vadd.f32 %v975_v29, %v974_v27 }
 0x2db   : > { %v983_v32 = vadd.f32 %v982_v30, %v981_v28 }
 0x2dc   : > { %v977_v33 = vrot.slane %v976_v31, 1 }
 0x2dd   : > { %v984_v34 = vrot.slane %v983_v32, 1 }
 0x2de   : > { %v978_v35 = vadd.f32 %v977_v33, %v976_v31 }
 0x2df   : > { %v985_v36 = vadd.f32 %v984_v34, %v983_v32 }
 0x2e0   : > { %v986_v37 = vmul.f32 0.25, %v978_v35 }
 0x2e1   : > { %v987_v38 = vmul.f32 0.25, %v985_v36 }
 0x2e2   : > { %v988_v39 = vsub.f32 %v970_v21, %v986_v37 }
 0x2e3   : > { %v989_v40 = vsub.f32 %v971_v22, %v987_v38 }
 0x2e4   : > { %v990_v41 = vmul.f32 %v988_v39, %v988_v39 }
 0x2e5   : > { %v991_v42 = vmul.f32 %v989_v40, %v989_v40 }
 0x2e6   : > { %v992_v43 = vsel %vm572_vm0, %v990_v41, 0.0 }
 0x2e7   : > { %v993_v44 = vrot.slane %v992_v43, 4  ;;  %v999_v45 = vsel %vm572_vm0, %v991_v42, 0.0 }
 0x2e8   : > { %v1000_v46 = vrot.slane %v999_v45, 4 }
 0x2e9   : > { %v994_v47 = vadd.f32 %v993_v44, %v992_v43 }
 0x2ea   : > { %v1001_v48 = vadd.f32 %v1000_v46, %v999_v45 }
 0x2eb   : > { %v995_v49 = vrot.slane %v994_v47, 2 }
 0x2ec   : > { %v1002_v50 = vrot.slane %v1001_v48, 2 }
 0x2ed   : > { %v996_v51 = vadd.f32 %v995_v49, %v994_v47 }
 0x2ee   : > { %v1003_v52 = vadd.f32 %v1002_v50, %v1001_v48 }
 0x2ef   : > { %v997_v10 = vrot.slane %v996_v51, 1 }
 0x2f0   : > { %v1004_v53 = vrot.slane %v1003_v52, 1 }
 0x2f1   : > { %v998_v54 = vadd.f32 %v997_v10, %v996_v51 }
 0x2f2   : > { %v1005_v55 = vadd.f32 %v1004_v53, %v1003_v52 }
 0x2f3   : > { %v1006_v56 = vmul.f32 0.25, %v998_v54 }
 0x2f4   : > { %v1007_v57 = vmul.f32 0.25, %v1005_v55 }
 0x2f5   : > { %v1008_v58 = vadd.f32 1e-06, %v1006_v56 }
 0x2f6   : > { %v1009_v59 = vadd.f32 1e-06, %v1007_v57 }
 0x2f7   : > { %1253 = vrsqrt.f32 %v1008_v58  ;;  %vm1016_vm15 = vweird.f32 %v1008_v58 }
 0x2f8   : > { %1255 = vrsqrt.f32 %v1009_v59  ;;  %vm1026_vm2 = vweird.f32 %v1009_v59 }
 0x2fd   : > { %v1254_v60 = vpop.eup %1253 }
 0x2fe   : > { %v1256_v61 = vpop.eup %1255  ;;  %v1011_v62 = vmul.f32 %v1254_v60, %v1008_v58  ;;  %vm1017_vm13 = vweird.f32 %v1254_v60 }
 0x2ff   : > { %v1021_v63 = vmul.f32 %v1256_v61, %v1009_v59  ;;  %vm1027_vm14 = vweird.f32 %v1256_v61  ;;  %vm1018_vm1 = vmor %vm1016_vm15, %vm1017_vm13 }
 0x300   : > { %v1012_v0 = vmul.f32 %v1254_v60, %v1011_v62  ;;  %vm1028_vm3 = vmor %vm1026_vm2, %vm1027_vm14 }
 0x301   : > { %v1022_v1 = vmul.f32 %v1256_v61, %v1021_v63 }
 0x302   : > { %v1013_v2 = vmul.f32 0.5, %v1012_v0 }
 0x303   : > { %v1023_v3 = vmul.f32 0.5, %v1022_v1 }
 0x304   : > { %v1014_v4 = vsub.f32 1.5, %v1013_v2 }
 0x305   : > { %v1024_v5 = vsub.f32 1.5, %v1023_v3 }
 0x306   : > { %v1015_v6 = vmul.f32 %v1254_v60, %v1014_v4 }
 0x307   : > { %v1025_v8 = vmul.f32 %v1256_v61, %v1024_v5 }
 0x308   : > { %v1019_v9 = vsel %vm1018_vm1, %v1254_v60, %v1015_v6 }
 0x309   : > { %v1030_v13 = vmul.f32 %v1019_v9, %v988_v39  ;;  %v1029_v12 = vsel %vm1028_vm3, %v1256_v61, %v1025_v8 }
 0x30a   : > { %v1031_v14 = vmul.f32 %v1029_v12, %v989_v40 }
 0x30b   : > { %v1032_v15 = vmul.f32 %v1030_v13, %v1499_v7 }
 0x30c   : > { %v1033_v17 = vmul.f32 %v1031_v14, %v1499_v7 }
 0x30d   : > { %v1034_v19 = vadd.f32 %v1032_v15, %v1502_v11 }
 0x30e   : > { %v1035_v18 = vadd.f32 %v1033_v17, %v1502_v11 }
 0x310   : > { %v1038_v20 = vrot.slane %v1035_v18, 4 }
 0x312   : > { %v1039_v16 = vsel %vm572_vm0, %v1034_v19, %v1038_v20 }
 0x313   : > { %1041 = vst [vmem:[%s534_s15] sm:$0xff] %v1039_v16 }
 0x314 PF: > { %s22_s23 = sadd.s32 1, %s1279_s23   ;;  %s1549_s21 = smov %s1275_s22 }
 0x315   : > { %p19_p5 = scmp.ge.s32.totalorder %s22_s23, 4   ;;  %s1550_s22 = smov %s1552_s24 }
 0x317   :  { %21 = sbr.rel (!%p19_p5) target bundleno = 2 (0x2), region = 107 }

</bundles_post_ra>
